<compile_context>
chip_gen: v5e
topology: v5e:2x2
jax: 0.10.0
libtpu: 0.0.40
codegen_flags: <defaults>
</compile_context>

<pallas_src>
import functools

import jax
import jax.numpy as jnp
from jax.experimental import pallas as pl
from jax.experimental.pallas import tpu as pltpu

_MIB = 1024 * 1024
_REDUCE_CHUNK = 512        # min lanes per f32 partial-sum chunk
_MAX_REDUCE_CHUNKS = 16    # max statically-unrolled chunks (bounds f32 temps & code size)
_FUSED_BLOCK_TARGET = 4 * _MIB   # target bytes per fused-path grid block (batch folding)


def _vmem_budgets():
    """Generation-aware VMEM limit & pipeline-buffer budget.

    v5e/v6e (128 MiB VMEM): limit 96 MiB, budget 88 MiB.
    v7x (64 MiB per-TC):    limit 48 MiB, budget 40 MiB.
    """
    cap = 64 * _MIB                                   # conservative default (v7x per-TC)
    try:
        cap = int(getattr(pltpu.get_tpu_info(), "vmem_capacity_bytes", cap))
    except Exception:                                 # defensive: keep default
        pass
    vmem_limit = max((cap * 3) // 4, cap - 32 * _MIB)
    tile_budget = max(vmem_limit - 8 * _MIB, vmem_limit // 2)
    return tile_budget, vmem_limit


def _lane_sums_f32(x_ref, *, lane_offset=None, lane_limit=None):
    """Per-row f32 sums over the lane axis of a (rows, L) VMEM ref.

    The reduction is split into at most _MAX_REDUCE_CHUNKS statically-unrolled,
    128-aligned chunks so the f32 intermediate is bounded (no full-block f32
    copy for sub-f32 input dtypes).  If lane_limit is given, lanes with global
    index lane_offset + j >= lane_limit are treated as zero (ragged H*W tiles).
    """
    rows, L = x_ref.shape
    n = max(1, min(_MAX_REDUCE_CHUNKS, pl.cdiv(L, _REDUCE_CHUNK)))
    chunk = ((pl.cdiv(L, n) + 127) // 128) * 128      # static, multiple of 128

    acc = jnp.zeros((rows, 1), jnp.float32)
    start = 0
    while start < L:                                   # static Python loop (<= 16 iters)
        size = min(chunk, L - start)
        xc = x_ref[:, pl.ds(start, size)].astype(jnp.float32)
        if lane_limit is not None:
            j = jax.lax.broadcasted_iota(jnp.int32, (rows, size), 1) + start
            if lane_offset is not None:
                j = j + lane_offset
            xc = jnp.where(j < lane_limit, xc, 0.0)
        acc = acc + jnp.sum(xc, axis=1, keepdims=True)
        start += size
    return acc


def _gate_from_sums(sums, w_ref, *, k, pad, inv_hw, cp):
    """sigmoid(conv1d_k(mean)) from per-(sample, channel) sums.

    sums:  (rows, 1) f32 with rows = n_samples_in_block * cp (each sample's cp
           channels stacked contiguously along the sublane axis).
    w_ref: (k,) f32 conv taps in SMEM.
    The k-tap conv over channels is k shifted multiply-adds (pltpu.roll over
    the sublane axis) with per-sample boundary masks, reproducing Conv1d's
    zero padding exactly (padded channels, if any, already have zero mean).
    """
    rows = sums.shape[0]
    y = sums * inv_hw                                        # channel means
    ridx = jax.lax.broadcasted_iota(jnp.int32, (rows, 1), 0)
    cidx = ridx % cp                                         # channel index within its sample
    conv = jnp.zeros_like(y)
    for i in range(k):                                       # k is small & static
        d = i - pad                                          # tap i reads y[c + d]
        if d == 0:
            tap = y
        else:
            shifted = pltpu.roll(y, shift=(-d) % rows, axis=0)   # -> y[(r + d) % rows]
            valid = (cidx + d >= 0) & (cidx + d < cp)            # Conv1d zero padding
            tap = jnp.where(valid, shifted, 0.0)
        conv = conv + w_ref[i] * tap
    return jax.nn.sigmoid(conv)


def _eca_fused_kernel(w_ref, x_ref, o_ref, *, k, pad, inv_hw, cp):
    """Single pass: pool + gate + scale.  x_ref: (Bt*Cp, HW); x read from HBM once."""
    sums = _lane_sums_f32(x_ref)                             # (Bt*Cp, 1) f32
    gate = _gate_from_sums(sums, w_ref, k=k, pad=pad, inv_hw=inv_hw, cp=cp)
    # Gate applied in the input dtype (matches the PyTorch module's dtype flow;
    # for bf16 inputs this rounds the gate to bf16 before the multiply).
    o_ref[...] = x_ref[...] * gate.astype(o_ref.dtype)       # lane-broadcast multiply


def _eca_pool_gate_kernel(w_ref, x_ref, g_ref, *, k, pad, inv_hw, hw, hw_tile, cp):
    """Pass 1 (tiled over H*W): accumulate channel sums, emit the gate at the end."""
    t = pl.program_id(1)

    @pl.when(t == 0)
    def _init():
        g_ref[...] = jnp.zeros_like(g_ref)

    if hw % hw_tile != 0:                                    # mask ragged last tile
        g_ref[...] += _lane_sums_f32(x_ref, lane_offset=t * hw_tile, lane_limit=hw)
    else:
        g_ref[...] += _lane_sums_f32(x_ref)

    @pl.when(t == pl.num_programs(1) - 1)
    def _finalize():
        g_ref[...] = _gate_from_sums(g_ref[...], w_ref, k=k, pad=pad,
                                     inv_hw=inv_hw, cp=cp)


def _eca_scale_kernel(x_ref, g_ref, o_ref):
    """Pass 2 (tiled over H*W): out = x * gate (gate broadcast along the lanes)."""
    o_ref[...] = x_ref[...] * g_ref[...].astype(o_ref.dtype)


def _pick_hw_tile(hw, cp, itemsize, budget_bytes, n_bufs):
    """Largest lane-dense (multiple-of-128) H*W tile fitting `n_bufs` pipeline buffers."""
    max_tile = budget_bytes // (n_bufs * cp * itemsize)
    if hw <= max_tile:
        return hw
    return max(128, (max_tile // 128) * 128)


def _pick_batch_fold(batch, sample_bytes, target_bytes):
    """Samples folded per fused grid block: a divisor of batch, block ~target_bytes,
    and at least 2 grid steps whenever batch >= 2 (v7x two-TC / pipelining)."""
    if batch <= 1:
        return 1
    bt_max = min(batch // 2, max(1, target_bytes // max(sample_bytes, 1)))
    bt = 1
    for cand in range(1, bt_max + 1):
        if batch % cand == 0:
            bt = cand
    return bt


def eca_forward(x, conv_weight, *, donate_x=False, force_two_pass=False, hw_tile=None):
    """ECA forward.  x: (B, C, H, W); conv_weight: (k,) (or (1, 1, k)) Conv1d taps."""
    B, C, H, W = x.shape
    HW = H * W
    w = conv_weight.reshape(-1).astype(jnp.float32)
    k = int(w.shape[0])
    pad = (k - 1) // 2
    inv_hw = 1.0 / float(HW)

    tile_budget, vmem_limit = _vmem_budgets()

    # Pad channels to the dtype's sublane-packing multiple (8 f32 / 16 bf16 / 32 int8).
    # Padded channels have zero mean (exactly Conv1d's zero padding) and are sliced
    # off at the end; a no-op for typical ECA channel counts.
    itemsize = x.dtype.itemsize
    sub = max(8, 32 // itemsize)
    Cp = ((C + sub - 1) // sub) * sub
    x3 = x.reshape(B, C, HW)
    if Cp != C:
        x3 = jnp.pad(x3, ((0, 0), (0, Cp - C), (0, 0)))

    sample_bytes = Cp * HW * itemsize
    # Fused path reads x from HBM once (2x total traffic vs 3x for two-pass); with
    # the chunked reduction, VMEM need is ~4 pipeline blocks (2 in + 2 out buffers).
    use_fused = (not force_two_pass) and (4 * sample_bytes <= tile_budget)

    def _cparams(sem):
        return pltpu.CompilerParams(dimension_semantics=sem,
                                    vmem_limit_bytes=vmem_limit)

    if use_fused:
        # Fold Bt samples per grid block when samples are small (e.g. the 7x7 / 14x14
        # ECA stages): amortizes the ~0.35us/step overhead and enlarges each DMA.
        Bt = _pick_batch_fold(B, sample_bytes,
                              min(_FUSED_BLOCK_TARGET, tile_budget // 4))
        rows = Bt * Cp
        xg = x3.reshape(B // Bt, rows, HW)                   # free (contiguous) view
        out = pl.pallas_call(
            functools.partial(_eca_fused_kernel, k=k, pad=pad, inv_hw=inv_hw, cp=Cp),
            out_shape=jax.ShapeDtypeStruct((B // Bt, rows, HW), x.dtype),
            grid=(B // Bt,),
            in_specs=[
                pl.BlockSpec(memory_space=pltpu.MemorySpace.SMEM),      # conv taps
                pl.BlockSpec((None, rows, HW), lambda g: (g, 0, 0)),    # Bt samples
            ],
            out_specs=pl.BlockSpec((None, rows, HW), lambda g: (g, 0, 0)),
            input_output_aliases={1: 0} if donate_x else {},
            compiler_params=_cparams(("parallel",)),
        )(w, xg)
        out3 = out.reshape(B, Cp, HW)
    else:
        # Two tiled passes when a whole sample exceeds the pipeline budget.
        # Pass 1 has only a tiny output block -> larger tile (2 input buffers only);
        # pass 2 streams input + output -> 4 buffers.
        if hw_tile is None:
            tile_p1 = _pick_hw_tile(HW, Cp, itemsize, tile_budget, n_bufs=2)
            tile_p2 = _pick_hw_tile(HW, Cp, itemsize, tile_budget, n_bufs=4)
        else:
            tile_p1 = tile_p2 = max(1, min(int(hw_tile), HW))

        gate = pl.pallas_call(
            functools.partial(_eca_pool_gate_kernel, k=k, pad=pad, inv_hw=inv_hw,
                              hw=HW, hw_tile=tile_p1, cp=Cp),
            out_shape=jax.ShapeDtypeStruct((B, Cp, 1), jnp.float32),
            grid=(B, pl.cdiv(HW, tile_p1)),
            in_specs=[
                pl.BlockSpec(memory_space=pltpu.MemorySpace.SMEM),
                pl.BlockSpec((None, Cp, tile_p1), lambda b, t: (b, 0, t)),
            ],
            out_specs=pl.BlockSpec((None, Cp, 1), lambda b, t: (b, 0, 0)),
            compiler_params=_cparams(("parallel", "arbitrary")),
        )(w, x3)

        out3 = pl.pallas_call(
            _eca_scale_kernel,
            out_shape=jax.ShapeDtypeStruct((B, Cp, HW), x.dtype),
            grid=(B, pl.cdiv(HW, tile_p2)),
            in_specs=[
                pl.BlockSpec((None, Cp, tile_p2), lambda b, t: (b, 0, t)),
                pl.BlockSpec((None, Cp, 1), lambda b, t: (b, 0, 0)),
            ],
            out_specs=pl.BlockSpec((None, Cp, tile_p2), lambda b, t: (b, 0, t)),
            input_output_aliases={0: 0} if donate_x else {},
            compiler_params=_cparams(("parallel", "parallel")),
        )(x3, gate)

    if Cp != C:
        out3 = out3[:, :C, :]
    return out3.reshape(B, C, H, W)


def eca_reference(x, conv_weight):
    """Pure-JAX reference mirroring the PyTorch forward."""
    w = conv_weight.reshape(-1)
    k = w.shape[0]
    pad = (k - 1) // 2
    y = jnp.mean(x, axis=(2, 3))                             # (B, C)
    yp = jnp.pad(y, ((0, 0), (pad, pad)))
    conv = sum(w[i] * yp[:, i:i + y.shape[1]] for i in range(k))
    gate = jax.nn.sigmoid(conv)
    return x * gate[:, :, None, None]


if __name__ == "__main__":
    key = jax.random.PRNGKey(0)
    kx, kw, kw5, kx2, kx3, kx4, kx5 = jax.random.split(key, 7)

    # --- Base config: B=2, C=4, 16x16, k=3 (fused single-pass path) --------------
    B, C, H, W = 2, 4, 16, 16
    k_size = 3
    x = jax.random.normal(kx, (B, C, H, W), dtype=jnp.float32)
    # Synthetic Conv1d(1, 1, k, bias=False) weight (PyTorch default init:
    # U(-b, b) with b = 1/sqrt(fan_in) = 1/sqrt(k)).
    bound = 1.0 / (k_size ** 0.5)
    w = jax.random.uniform(kw, (k_size,), minval=-bound, maxval=bound,
                           dtype=jnp.float32)

    ref = eca_reference(x, w)
    out = jax.block_until_ready(eca_forward(x, w))
    assert out.shape == x.shape and out.dtype == x.dtype
    assert jnp.allclose(out, ref, atol=1e-5, rtol=1e-5), "fused path mismatch"

    # --- Fused path: batch folding + channel padding + small HW (7x7), k=5 -------
    x_f = jax.random.normal(kx3, (8, 6, 7, 7), dtype=jnp.float32)
    bound5 = 1.0 / (5 ** 0.5)
    w5 = jax.random.uniform(kw5, (5,), minval=-bound5, maxval=bound5,
                            dtype=jnp.float32)
    out_f = jax.block_until_ready(eca_forward(x_f, w5))
    assert jnp.allclose(out_f, eca_reference(x_f, w5), atol=1e-5, rtol=1e-5), \
        "batch-folded fused path mismatch"

    # --- Fused path with a multi-chunk lane reduction (HW = 5120) ----------------
    x_l = jax.random.normal(kx5, (1, 8, 64, 80), dtype=jnp.float32)
    out_l = jax.block_until_ready(eca_forward(x_l, w))
    assert jnp.allclose(out_l, eca_reference(x_l, w), atol=1e-5, rtol=1e-5), \
        "chunked-reduction fused path mismatch"

    # --- Two-pass tiled path (forced), evenly divisible H*W tiles ----------------
    out2 = jax.block_until_ready(eca_forward(x, w, force_two_pass=True, hw_tile=128))
    assert jnp.allclose(out2, ref, atol=1e-5, rtol=1e-5), "two-pass path mismatch"

    # --- Two-pass tiled path with a ragged (masked) last H*W tile ----------------
    x2 = jax.random.normal(kx2, (1, 4, 12, 12), dtype=jnp.float32)
    out3 = jax.block_until_ready(eca_forward(x2, w, force_two_pass=True, hw_tile=128))
    assert jnp.allclose(out3, eca_reference(x2, w), atol=1e-5, rtol=1e-5), \
        "ragged tile mismatch"

    # --- bf16 input (Cp padded to 16; gate applied in the input dtype) -----------
    x_bf = jax.random.normal(kx4, (2, 10, 8, 8), dtype=jnp.bfloat16)
    out_bf = jax.block_until_ready(eca_forward(x_bf, w))
    ref_bf = eca_reference(x_bf.astype(jnp.float32), w)
    assert out_bf.dtype == jnp.bfloat16
    assert jnp.allclose(out_bf.astype(jnp.float32), ref_bf, atol=3e-2, rtol=3e-2), \
        "bf16 path mismatch"

    # --- Donated-input variant (output reuses x's HBM buffer) --------------------
    donate_fn = jax.jit(functools.partial(eca_forward, donate_x=True))
    out_d = jax.block_until_ready(donate_fn(x, w))
    assert jnp.allclose(out_d, ref, atol=1e-5, rtol=1e-5), "donated-input mismatch"

    print("KERNEL_OK")
</pallas_src>

<mosaic_0001>
module attributes {stable_mosaic.version = 11 : i64} {
  func.func @_eca_fused_kernel(%arg0: i32, %arg1: memref<3xf32, #tpu.memory_space<smem>>, %arg2: memref<1x8x256xf32, #tpu.memory_space<vmem>>, %arg3: memref<1x8x256xf32, #tpu.memory_space<vmem>>) attributes {dimension_semantics = [#tpu.dimension_semantics<parallel>], iteration_bounds = array<i64: 2>, scalar_prefetch = 0 : i64, scratch_operands = 0 : i64, tpu.core_type = #tpu.core_type<tc>, window_params = [{transform_indices = @transform_0, window_bounds = array<i64: 3>}, {transform_indices = @transform_1, window_bounds = array<i64: 1, 8, 256>}, {transform_indices = @transform_2, window_bounds = array<i64: 1, 8, 256>}]} {
    %cst = arith.constant 0.000000e+00 : f32
    %0 = vector.broadcast %cst : f32 to vector<8x1xf32>
    %c0 = arith.constant 0 : index
    %c0_0 = arith.constant 0 : index
    %c0_1 = arith.constant 0 : index
    %1 = vector.load %arg2[%c0, %c0_0, %c0_1] : memref<1x8x256xf32, #tpu.memory_space<vmem>>, vector<1x8x256xf32>
    %2 = vector.shape_cast %1 : vector<1x8x256xf32> to vector<8x256xf32>
    %cst_2 = arith.constant dense<0.000000e+00> : vector<8xf32>
    %3 = vector.multi_reduction <add>, %2, %cst_2 [1] : vector<8x256xf32> to vector<8xf32>
    %4 = vector.shape_cast %3 : vector<8xf32> to vector<8x1xf32>
    %5 = arith.addf %0, %4 : vector<8x1xf32>
    %cst_3 = arith.constant 3.906250e-03 : f32
    %6 = vector.broadcast %cst_3 : f32 to vector<8x1xf32>
    %7 = arith.mulf %5, %6 : vector<8x1xf32>
    %8 = tpu.iota {dimensions = array<i32: 0>} : vector<8x1xi32>
    %c8_i32 = arith.constant 8 : i32
    %c0_i32 = arith.constant 0 : i32
    %9 = arith.cmpi eq, %c8_i32, %c0_i32 : i32
    %c1_i32 = arith.constant 1 : i32
    %10 = arith.select %9, %c1_i32, %c8_i32 : i32
    %11 = vector.broadcast %10 : i32 to vector<8x1xi32>
    %12 = arith.remsi %8, %11 : vector<8x1xi32>
    %c0_i32_4 = arith.constant 0 : i32
    %13 = vector.broadcast %c0_i32_4 : i32 to vector<8x1xi32>
    %14 = arith.cmpi ne, %12, %13 : vector<8x1xi32>
    %c0_i32_5 = arith.constant 0 : i32
    %15 = vector.broadcast %c0_i32_5 : i32 to vector<8x1xi32>
    %16 = arith.cmpi slt, %12, %15 : vector<8x1xi32>
    %c0_i32_6 = arith.constant 0 : i32
    %17 = arith.cmpi slt, %10, %c0_i32_6 : i32
    %18 = vector.broadcast %17 : i1 to vector<8x1xi1>
    %19 = vector.broadcast %18 : vector<8x1xi1> to vector<8x1xi1>
    %20 = arith.xori %16, %19 : vector<8x1xi1>
    %21 = arith.andi %20, %14 : vector<8x1xi1>
    %22 = vector.broadcast %10 : i32 to vector<8x1xi32>
    %23 = arith.addi %12, %22 : vector<8x1xi32>
    %24 = arith.select %21, %23, %12 : vector<8x1xi1>, vector<8x1xi32>
    %cst_7 = arith.constant 0.000000e+00 : f32
    %25 = vector.broadcast %cst_7 : f32 to vector<8x1xf32>
    %c1_i32_8 = arith.constant 1 : i32
    %26 = tpu.dynamic_rotate %7 by %c1_i32_8 dim 0 : vector<8x1xf32>, i32 -> vector<8x1xf32>
    %c-1_i32 = arith.constant -1 : i32
    %27 = vector.broadcast %c-1_i32 : i32 to vector<8x1xi32>
    %28 = arith.addi %24, %27 : vector<8x1xi32>
    %c0_i32_9 = arith.constant 0 : i32
    %29 = vector.broadcast %c0_i32_9 : i32 to vector<8x1xi32>
    %30 = arith.cmpi sge, %28, %29 : vector<8x1xi32>
    %c-1_i32_10 = arith.constant -1 : i32
    %31 = vector.broadcast %c-1_i32_10 : i32 to vector<8x1xi32>
    %32 = arith.addi %24, %31 : vector<8x1xi32>
    %c8_i32_11 = arith.constant 8 : i32
    %33 = vector.broadcast %c8_i32_11 : i32 to vector<8x1xi32>
    %34 = arith.cmpi slt, %32, %33 : vector<8x1xi32>
    %35 = arith.andi %30, %34 : vector<8x1xi1>
    %cst_12 = arith.constant 0.000000e+00 : f32
    %36 = vector.broadcast %cst_12 : f32 to vector<8x1xf32>
    %37 = arith.select %35, %26, %36 : vector<8x1xi1>, vector<8x1xf32>
    %c0_13 = arith.constant 0 : index
    %38 = memref.load %arg1[%c0_13] : memref<3xf32, #tpu.memory_space<smem>>
    %39 = vector.broadcast %38 : f32 to vector<8x1xf32>
    %40 = arith.mulf %39, %37 : vector<8x1xf32>
    %41 = arith.addf %25, %40 : vector<8x1xf32>
    %c1 = arith.constant 1 : index
    %42 = memref.load %arg1[%c1] : memref<3xf32, #tpu.memory_space<smem>>
    %43 = vector.broadcast %42 : f32 to vector<8x1xf32>
    %44 = arith.mulf %43, %7 : vector<8x1xf32>
    %45 = arith.addf %41, %44 : vector<8x1xf32>
    %c7_i32 = arith.constant 7 : i32
    %46 = tpu.dynamic_rotate %7 by %c7_i32 dim 0 : vector<8x1xf32>, i32 -> vector<8x1xf32>
    %c1_i32_14 = arith.constant 1 : i32
    %47 = vector.broadcast %c1_i32_14 : i32 to vector<8x1xi32>
    %48 = arith.addi %24, %47 : vector<8x1xi32>
    %c0_i32_15 = arith.constant 0 : i32
    %49 = vector.broadcast %c0_i32_15 : i32 to vector<8x1xi32>
    %50 = arith.cmpi sge, %48, %49 : vector<8x1xi32>
    %c1_i32_16 = arith.constant 1 : i32
    %51 = vector.broadcast %c1_i32_16 : i32 to vector<8x1xi32>
    %52 = arith.addi %24, %51 : vector<8x1xi32>
    %c8_i32_17 = arith.constant 8 : i32
    %53 = vector.broadcast %c8_i32_17 : i32 to vector<8x1xi32>
    %54 = arith.cmpi slt, %52, %53 : vector<8x1xi32>
    %55 = arith.andi %50, %54 : vector<8x1xi1>
    %cst_18 = arith.constant 0.000000e+00 : f32
    %56 = vector.broadcast %cst_18 : f32 to vector<8x1xf32>
    %57 = arith.select %55, %46, %56 : vector<8x1xi1>, vector<8x1xf32>
    %c2 = arith.constant 2 : index
    %58 = memref.load %arg1[%c2] : memref<3xf32, #tpu.memory_space<smem>>
    %59 = vector.broadcast %58 : f32 to vector<8x1xf32>
    %60 = arith.mulf %59, %57 : vector<8x1xf32>
    %61 = arith.addf %45, %60 : vector<8x1xf32>
    %62 = arith.negf %61 : vector<8x1xf32>
    %63 = math.exp %62 : vector<8x1xf32>
    %cst_19 = arith.constant 1.000000e+00 : f32
    %64 = vector.broadcast %cst_19 : f32 to vector<8x1xf32>
    %65 = arith.addf %64, %63 : vector<8x1xf32>
    %66 = arith.divf %64, %65 : vector<8x1xf32>
    %c0_20 = arith.constant 0 : index
    %c0_21 = arith.constant 0 : index
    %c0_22 = arith.constant 0 : index
    %67 = vector.load %arg2[%c0_20, %c0_21, %c0_22] : memref<1x8x256xf32, #tpu.memory_space<vmem>>, vector<1x8x256xf32>
    %68 = vector.shape_cast %67 : vector<1x8x256xf32> to vector<8x256xf32>
    %69 = vector.broadcast %66 : vector<8x1xf32> to vector<8x256xf32>
    %70 = arith.mulf %68, %69 : vector<8x256xf32>
    %c0_23 = arith.constant 0 : index
    %c0_24 = arith.constant 0 : index
    %c0_25 = arith.constant 0 : index
    %71 = vector.load %arg3[%c0_23, %c0_24, %c0_25] : memref<1x8x256xf32, #tpu.memory_space<vmem>>, vector<1x8x256xf32>
    %72 = vector.shape_cast %71 : vector<1x8x256xf32> to vector<8x256xf32>
    %73 = vector.shape_cast %70 : vector<8x256xf32> to vector<1x8x256xf32>
    tpu.vector_store %arg3[%c0_23, %c0_24, %c0_25], %73 {strides = array<i32>} : memref<1x8x256xf32, #tpu.memory_space<vmem>>, vector<1x8x256xf32>,
    return
  }
  func.func @transform_0(%arg0: i32) -> i32 {
    %c0_i32 = arith.constant 0 : i32
    %c0_i32_0 = arith.constant 0 : i32
    return %c0_i32 : i32
  }
  func.func @transform_1(%arg0: i32) -> (i32, i32, i32) {
    %c0_i32 = arith.constant 0 : i32
    %c0_i32_0 = arith.constant 0 : i32
    %c0_i32_1 = arith.constant 0 : i32
    return %arg0, %c0_i32, %c0_i32_0 : i32, i32, i32
  }
  func.func @transform_2(%arg0: i32) -> (i32, i32, i32) {
    %c0_i32 = arith.constant 0 : i32
    %c0_i32_0 = arith.constant 0 : i32
    %c0_i32_1 = arith.constant 0 : i32
    return %arg0, %c0_i32, %c0_i32_0 : i32, i32, i32
  }
}

</mosaic_0001>

<bundles_post_ra>
// kernel: tpu_custom_call.1
= control target key start
LH: loop header
LB: loop body
LE: loop exit
PB: predicated region body
PF: predicated region fallthrough
CT: control target
= control target key end

     0   :  { %7 = vsyncpa [#allocation5], 0  ;;  %s708_s0 = inlined_call_operand.hbm [shape: f32[3], index: 0, kind: input, shape index: {}]   ;;  %s709_s1 = inlined_call_operand.hbm [shape: f32[2,8,256], index: 1, kind: input, shape index: {}]   ;;  %s710_s2 = inlined_call_operand.hbm [shape: f32[2,8,256], index: 2, kind: output, shape index: {}]  }
   0x1   :  { %8 = vsyncpa [#allocation3], 0 }
   0x2   :  { %10 = vsyncpa [#allocation3 + $0x1], 0 }
   0x3   :  { %11 = vsyncpa [#allocation4], 0 }
   0x4   :  { %13 = vsyncpa [#allocation4 + $0x1], 0  ;;  %s566_s9 = smov 0   ;;  %s568_s10 = smov 0  }
   0x5   :  { %s570_s11 = smov 0   ;;  %s572_s12 = smov 0  }
   0x6 LB: > { %s587_s13 = sadd.s32 4294967295, %s547_s12   ;;  %s348_s14 = sadd.s32 4294967294, %s547_s12   ;;  %s547_s12 = sphi %s572_s12, %s720_s12   ;;  %s543_s11 = sphi %s570_s11, %s719_s11   ;;  %s539_s10 = sphi %s568_s10, %s718_s10   ;;  %s535_s9 = sphi %s566_s9, %s717_s9  }
   0x7   : > { %p60_p0 = scmp.ne.s32.totalorder %s539_s10, %s535_s9  ;;  %p61_p1 = scmp.eq.s32.totalorder %s587_s13, 0 }
   0x8   : > { %p84_p2 = scmp.eq.s32.totalorder %s587_s13, 1  ;;  %p90_p3 = scmp.eq.s32.totalorder %s348_s14, 1 }
   0x9   : > { %p596_p4 = por %p61_p1, %p60_p0  ;;  %p349_p5 = scmp.ge.s32.totalorder %s547_s12, 1 }
   0xa   : > { %p601_p6 = por %p90_p3, %p60_p0  ;;  %p97_p7 = scmp.lt.s32.totalorder %s547_s12, 3 }
   0xb   : > { %s109_s19 = sshll.u32 %s708_s0, 4  ;;  %s617_s21 = sadd.s32 1, %s547_s12   ;;  %s110_s19 = int_to_ptr.hbm [resolvable:$true] %s109_s19 }
   0xc   : > { %p609_p8 = pnand %p349_p5, %p97_p7  ;;  %s44_s22 = ssub.s32 %s547_s12, %s617_s21 }
   0xd   : > { %p45_p12 = scmp.eq.s32.totalorder %s44_s22, 0  ;;  %s47_s23 = sadd.s32 1, %s543_s11 }
   0xe   : > { %p377_p10 = pneg %p609_p8  ;;  %p54_p13 = scmp.ne.s32.totalorder %s543_s11, %s539_s10 }
   0xf   : > { %s549_s24 = smov [#allocation2]   ;;  %p55_p0 = scmp.eq.s32.totalorder %s547_s12, 0 }
  0x10   : > { %p378_p11 = pnand %p377_p10, %p61_p1  ;;  %p632_p3 = por %p84_p2, %p54_p13 }
  0x11   : > { %s627_s25 = scalar_select %p45_p12, %s543_s11, %s47_s23  }
  0x12   : > { %380 = dma.hbm_to_smem (!%p378_p11), %s110_s19, 16, %s549_s24, [#allocation5]  }
  0x13   : > { %s120_s27 = sand.u32 1, %s543_s11   ;;  %p56_p5 = por %p55_p0, %p54_p13 }
  0x14   : > { %p390_p7 = scmp.lt.s32.totalorder %s547_s12, 2  ;;  %s352_s28 = sshll.u32 %s120_s27, 4 }
  0x15   : > { %s367_s29 = sshll.u32 %s547_s12, 4  ;;  %s124_s6 = scalar_lea.vmem [#allocation6], %s352_s28 }
  0x16   : > { %s129_s4 = scalar_lea.hbm %s709_s1, %s367_s29  ;;  %s133_s7 = sshll.u32 %s124_s6, 4  ;;  %s134_s7 = int_to_ptr.vmem [resolvable:$true] %s133_s7 }
  0x17   : > { %s131_s5 = sshll.u32 %s129_s4, 4  ;;  %p642_p10 = pnand %p390_p7, %p56_p5  ;;  %s132_s5 = int_to_ptr.hbm [resolvable:$true] %s131_s5 }
  0x18   : > { %s121_s14 = scalar_lea.sflag [#allocation3], %s120_s27  ;;  %s447_s17 = sshra.s32 %s132_s5, 4  ;;  %s448_s17 = int_to_ptr.hbm [resolvable:$true] %s447_s17 }
  0x19   : > { %s449_s18 = scalar_lea.hbm %s448_s17, 16  ;;  %p451_p11 = pneg %p642_p10 }
  0x1a   : > { %p450_p2 = scmp.ne.s32.totalorder %s448_s17, %s449_s18  ;;  %s454_s23 = scalar_lea.hbm %s709_s1, 32 }
  0x1b   : > { %p455_p0 = scmp.lt.s32.totalorder %s448_s17, %s709_s1  ;;  %p456_p5 = scmp.lt.s32.totalorder %s454_s23, %s449_s18 }
  0x1c   : > { %p452_p12 = pnand %p451_p11, %p450_p2 }
  0x1d   : > { %p457_p7 = por %p456_p5, %p455_p0 }
  0x1e   : > { %p453_p13 = pneg %p452_p12 }
  0x20   : > { %p458_p9 = pnand %p457_p7, %p453_p13 }
  0x22   : > { %461 = shalt.err (!%p458_p9)
}
  0x23   : > { %384 = dma.hbm_to_vmem [thread:$0]  (!%p642_p10), %s132_s5, 256, %s134_s7, %s121_s14  }
  0x24   : > { %142 = sbr.rel (%p609_p8) target bundleno = 327 (0x147), region = 28 }
  0x29   : > { %522 = dma.done.wait (%p61_p1), [#allocation5], 16  }
  0x2a   : > { %524 = vsyncadd (%p61_p1), [#allocation5], 4294967280  ;;  %s663_s27 = sand.u32 1, %s539_s10  }
  0x2b   : > { %s357_s29 = sshll.u32 %s663_s27, 4  ;;  %s150_s30 = scalar_lea.sflag [#allocation3], %s663_s27 }
  0x2c   : > { %s153_s3 = scalar_lea.vmem [#allocation6], %s357_s29 }
  0x2d   : > { %526 = dma.done.wait (%p596_p4), %s150_s30, 256  }
  0x2e   : > { %528 = vsyncadd (%p596_p4), %s150_s30, 4294967040 }
  0x2f   : > { %159 = sfence }
  0x30   : > { %v176_v0 = vld [vmem:[%s153_s3] sm:$0xff]  ;;  %v177_v1 = vld [vmem:[%s153_s3 + $0x8] sm:$0xff]  ;;  %v183_v3 = vlaneseq  ;;  %v550_v5 = vmov 0   ;;  %s203_s20 = sld [smem:[#allocation2]]  ;;  %s368_s15 = sshll.u32 %s587_s13, 4 }
  0x31   : > { %v178_v2 = vadd.f32 %v177_v1, %v176_v0  ;;  %427 = vset.pattern.permute.xlu0 %v550_v5  ;;  %s359_s4 = sld [smem:[#allocation2 + $0x1]]  ;;  %s261_s8 = scalar_lea.hbm %s710_s2, %s368_s15 }
  0x32   : > { %v184_v4 = vshrl.u32 %v183_v3, 7  ;;  %s360_s5 = sld [smem:[#allocation2 + $0x2]]  ;;  %s175_s14 = scalar_lea.vmem [#allocation7], %s357_s29 }
  0x33   : > { %179 = vadd.xlane.f32.xlu0 %v178_v2  ;;  %s263_s17 = sshll.u32 %s175_s14, 4  ;;  %s265_s18 = sshll.u32 %s261_s8, 4  ;;  %s264_s17 = int_to_ptr.vmem [resolvable:$true] %s263_s17  ;;  %s266_s18 = int_to_ptr.hbm [resolvable:$true] %s265_s18 }
  0x34   : > { %v189_v6 = vand.u32 7, %v184_v4  ;;  %s250_s19 = scalar_lea.sflag [#allocation4], %s663_s27  ;;  %s491_s22 = sshra.s32 %s266_s18, 4  ;;  %s492_s22 = int_to_ptr.hbm [resolvable:$true] %s491_s22 }
  0x35   : > { %s493_s13 = scalar_lea.hbm %s492_s22, 16  ;;  %s497_s28 = scalar_lea.hbm %s710_s2, 32 }
  0x36   : > { %v198_v7 = vadd.s32 4294967295, %v189_v6  ;;  %v212_v8 = vadd.s32 1, %v189_v6  ;;  %v204_v11 = vstv %s203_s20  ;;  %p494_p1 = scmp.ne.s32.totalorder %s492_s22, %s493_s13  ;;  %p498_p9 = scmp.lt.s32.totalorder %s492_s22, %s710_s2 }
  0x37   : > { %v208_v12 = vstv %s359_s4  ;;  %p499_p10 = scmp.lt.s32.totalorder %s497_s28, %s493_s13 }
  0x38   : > { %vm199_vm0 = vcmp.ge.s32.totalorder %v198_v7, 0  ;;  %vm214_vm1 = vcmp.lt.s32.totalorder %v212_v8, 8  ;;  %v218_v15 = vstv %s360_s5  ;;  %p495_p4 = pnand %p494_p1, %p632_p3 }
  0x39   : > { %p500_p2 = por %p499_p10, %p498_p9 }
  0x3a   : > { %p496_p8 = pneg %p495_p4 }
  0x3c   : > { %p501_p11 = pnand %p500_p2, %p496_p8 }
  0xa6   : > { %v180_v9 = vpop.xlane.xlu0 %179 }
  0xa7   : > { %v182_v10 = vmul.f32 0.00390625, %v180_v9 }
  0xa9   : > { %v197_v13 = vrot.slane %v182_v10, 7  ;;  %v211_v14 = vrot.slane %v182_v10, 1  ;;  %v209_v19 = vmul.f32 %v208_v12, %v182_v10 }
  0xab   : > { %v202_v16 = vsel %vm199_vm0, %v197_v13, 0.0  ;;  %v216_v17 = vsel %vm214_vm1, %v211_v14, 0.0 }
  0xac   : > { %v205_v18 = vmul.f32 %v204_v11, %v202_v16  ;;  %v219_v21 = vmul.f32 %v218_v15, %v216_v17 }
  0xae   : > { %v210_v20 = vadd.f32 %v209_v19, %v205_v18 }
  0xb0   : > { %v220_v22 = vadd.f32 %v219_v21, %v210_v20 }
  0xb2   : > { %v361_v23 = vmul.f32 -1.442695, %v220_v22 }
  0xb4   : > { %428 = vpow2.f32 %v361_v23 }
  0xba   : > { %v429_v24 = vpop.eup %428 }
  0xbb   : > { %v224_v25 = vadd.f32 1.0, %v429_v24 }
  0xbd   : > { %430 = vrcp.f32 %v224_v25  ;;  %v236_v29 = vand.u32 2147483648, %v224_v25  ;;  %v234_v31 = vand.u32 2147483647, %v224_v25  ;;  %vm230_vm3 = vweird.f32 %v224_v25 }
  0xbf   : > { %v237_v33 = vor.u32 1.1754944e-38, %v236_v29  ;;  %vm235_vm5 = vcmp.eq.f32.partialorder %v234_v31, 8.507059e+37 }
  0xc3   : > { %v431_v26 = vpop.eup %430 }
  0xc4   : > { %v226_v27 = vmul.f32 %v431_v26, %v224_v25  ;;  %vm231_vm2 = vweird.f32 %v431_v26 }
  0xc5   : > { %vm232_vm4 = vmor %vm230_vm3, %vm231_vm2 }
  0xc6   : > { %v227_v28 = vsub.f32 1.0, %v226_v27 }
  0xc8   : > { %v228_v30 = vmul.f32 %v431_v26, %v227_v28 }
  0xca   : > { %v229_v32 = vadd.f32 %v431_v26, %v228_v30 }
  0xcc   : > { %v233_v34 = vsel %vm232_vm4, %v431_v26, %v229_v32 }
  0xcd   : > { %v238_v35 = vsel %vm235_vm5, %v237_v33, %v233_v34 }
  0xce   : > { %242 = vperm.xlu0 %427, %v238_v35  }
 0x140   : > { %v243_v36 = vpop.permute.xlu0 %242 }
 0x141   : > { %v245_v37 = vmul.f32 %v243_v36, %v176_v0  ;;  %v246_v38 = vmul.f32 %v243_v36, %v177_v1 }
 0x143   : > { %247 = vst [vmem:[%s175_s14] sm:$0xff] %v245_v37 }
 0x144   : > { %248 = vst [vmem:[%s175_s14 + $0x8] sm:$0xff] %v246_v38 }
 0x145   : > { %504 = shalt.err (!%p501_p11)
}
 0x146   : > { %375 = dma.vmem_to_hbm [thread:$0]  (%p632_p3), %s264_s17, 256, %s266_s18, %s250_s19  }
 0x147 PF: > { %s277_s27 = sand.u32 1, %s535_s9   ;;  %p716_p12 = scmp.ge.s32.totalorder %s547_s12, 2 }
 0x148   : > { %s278_s3 = scalar_lea.sflag [#allocation4], %s277_s27 }
 0x149   : > { %p386_p13 = pnand %p716_p12, %p601_p6 }
 0x14b   : > { %p387_p0 = pneg %p386_p13 }
 0x14d   : > { %530 = dma.done.wait (%p387_p0), %s278_s3, 256  }
 0x14e   : > { %532 = vsyncadd (%p387_p0), %s278_s3, 4294967040  ;;  %p16_p5 = scmp.ge.s32.totalorder %s617_s21, 4   ;;  %s717_s9 = smov %s539_s10 }
 0x14f   : > { %s718_s10 = smov %s543_s11  ;;  %s719_s11 = smov %s627_s25 }
 0x150   : > { %s720_s12 = smov %s617_s21  ;;  %18 = sbr.rel (!%p16_p5) target bundleno = 6 (0x6), region = 78 }
 0x155   :  { %284 = vsyncpa [#allocation3], 1 }
 0x156   :  { %286 = vsyncpa [#allocation3 + $0x1], 1 }
 0x157   :  { %287 = vsyncpa [#allocation4], 1 }
 0x158   :  { %289 = vsyncpa [#allocation4 + $0x1], 1 }
 0x159   :  { %290 = vsyncpa [#allocation5], 1 }
 0x15a   :  { %292 = vsyncpa [#allocation5 + $0x1], 1 }

</bundles_post_ra>
